<compile_context>
chip_gen: v6e
topology: v6e:2x2x1
jax: 0.10.0
libtpu: 0.0.40
codegen_flags: <defaults>
</compile_context>

<pallas_src>
import jax
import jax.numpy as jnp
from jax.experimental import pallas as pl
from jax.experimental.pallas import tpu as pltpu

H = 32             # hidden size from layer_config
LANE = 128         # TPU lane width
MAX_TILE_B = 8192  # batch-tile cap; sweep 8K-32K (cap ~32K on v7x's 64 MiB VMEM,
                   # or raise pltpu.CompilerParams(vmem_limit_bytes=...) with headroom)


def follower_kernel(x_ref, w2_ref, cols_ref, o_ref):
    x = x_ref[...]                      # (2, TB): row 0 = value, row 1 = date
    value = x[0:1, :]                   # (1, TB)
    date = x[1:2, :]                    # (1, TB)

    cols = cols_ref[...]                # (H, 8) packed parameter columns
    w1_val = cols[:, 0:1]               # (H, 1)  W1[:, 0]
    w1_date = cols[:, 1:2]              # (H, 1)  a * W1[:, 1]       (emb folded in)
    b1 = cols[:, 2:3]                   # (H, 1)  b1 + c * W1[:, 1]  (emb folded in)
    b2 = cols[:, 3:4]                   # (H, 1)
    w3 = cols[:, 4:5]                   # (H, 1)  W3[0, :]
    b3 = cols[0:1, 5:6]                 # (1, 1)

    # Layer 1 (emb/emb_linear folded in): K=2 -> pure VPU broadcast FMAs, no MXU.
    # The (H,1) lane-broadcasts should stay fused into the FMAs; if a bundle dump at
    # large TILE_B ever shows them materialized as (H,TB) VMEM temporaries, splat each
    # column into a reused vreg instead.
    h = w1_val * value + w1_date * date + b1                      # (H, TB)
    h = jnp.maximum(h, 0.0)

    # Layer 2: the only real matmul -> MXU, M=K=H, N=TILE_B (lane-filled).
    h = jnp.dot(w2_ref[...], h, preferred_element_type=jnp.float32) + b2
    h = jnp.maximum(h, 0.0)

    # Layer 3: (1,H) x (H,TB) as elementwise multiply + sublane reduce (XLU); MXU free.
    y = jnp.sum(h * w3, axis=0, keepdims=True) + b3               # (1, TB)

    o_ref[...] = jax.nn.sigmoid(y)                                # EUP


def prepare_params(p):
    """Fold emb/emb_linear into layer 1 and pack all small params into one (H, 8) slab.
    In real use, call once and reuse the result across forward calls."""
    a = jnp.dot(p["W_el"][0], p["W_emb"][:, 0])                   # scalar: W_el . W_emb
    c = jnp.dot(p["W_el"][0], p["b_emb"]) + p["b_el"][0]          # scalar
    w1_val = p["W1"][:, 0]
    w1_date = a * p["W1"][:, 1]
    b1_eff = p["b1"] + c * p["W1"][:, 1]
    b3_col = jnp.full((H,), p["b3"][0], jnp.float32)
    pad = jnp.zeros((H,), jnp.float32)
    cols = jnp.stack(
        [w1_val, w1_date, b1_eff, p["b2"], p["W3"][0], b3_col, pad, pad], axis=1
    ).astype(jnp.float32)                                         # (H, 8)
    return p["W2"].astype(jnp.float32), cols


def _choose_tile_b(B):
    """Largest lane-aligned batch tile <= MAX_TILE_B, preferring >= 2 grid steps
    whenever the batch allows it (so "parallel" shards across v7x's 2 TensorCores)."""
    b_lanes = pl.cdiv(B, LANE) * LANE
    if b_lanes <= LANE:
        return LANE                              # a single partial tile; nothing to shard
    half = pl.cdiv(pl.cdiv(b_lanes, 2), LANE) * LANE
    return max(LANE, min(MAX_TILE_B, half))


def follower_reaction_forward(x, params):
    """Forward pass.

    x: (2,)   single sample [value, date]  -> returns (1,)  (original module semantics)
       (2, B) feature-major batch          -> returns (B,)  (preferred: zero-copy layout)
       (B, 2) sample-major batch           -> returns (B,)  (convenience; costs one extra
                                                             HBM transpose pass)
    """
    x = jnp.asarray(x, jnp.float32)
    single = x.ndim == 1
    if single:
        x = x[:, None]                           # (2, 1)
    elif x.shape[0] == 2:
        pass                                     # feature-major (2, B): zero-copy path
    elif x.shape[-1] == 2:
        x = x.T                                  # convenience path: one extra HBM pass
    else:
        raise ValueError("x must have shape (2,), (2, B) or (B, 2)")
    B = x.shape[1]

    tile_b = _choose_tile_b(B)
    n_tiles = pl.cdiv(B, tile_b)                 # ragged last tile handled by Pallas
    w2, cols = prepare_params(params)

    out = pl.pallas_call(
        follower_kernel,
        out_shape=jax.ShapeDtypeStruct((1, B), jnp.float32),
        grid=(n_tiles,),
        in_specs=[
            # Streaming input block, batch on lanes.  If a trace at very large tiles
            # ever shows this DMA exposed, deepen with pipeline_mode=pl.Buffered(3)
            # on this spec only (W2/cols stay resident and need no extra buffering).
            pl.BlockSpec((2, tile_b), lambda i: (0, i)),
            pl.BlockSpec((H, H), lambda i: (0, 0)),   # W2: resident across grid steps
            pl.BlockSpec((H, 8), lambda i: (0, 0)),   # packed param slab: resident
        ],
        out_specs=pl.BlockSpec((1, tile_b), lambda i: (0, i)),   # lane-dense output
        compiler_params=pltpu.CompilerParams(
            dimension_semantics=("parallel",)),
    )(x, w2, cols)

    # Free layout-preserving squeeze: (1, B) -> (B,); (1, 1) -> (1,) for a single sample.
    return out[0]


def init_params(key):
    """Deterministic synthetic weights in native nn.Linear orientation (out, in)."""
    ks = jax.random.split(key, 10)
    s = 0.1
    return {
        "W_emb": s * jax.random.normal(ks[0], (2, 1), jnp.float32),  # Linear(1,2).weight
        "b_emb": s * jax.random.normal(ks[1], (2,), jnp.float32),
        "W_el":  s * jax.random.normal(ks[2], (1, 2), jnp.float32),  # Linear(2,1).weight
        "b_el":  s * jax.random.normal(ks[3], (1,), jnp.float32),
        "W1":    s * jax.random.normal(ks[4], (H, 2), jnp.float32),  # Linear(2,H).weight
        "b1":    s * jax.random.normal(ks[5], (H,), jnp.float32),
        "W2":    s * jax.random.normal(ks[6], (H, H), jnp.float32),  # Linear(H,H).weight
        "b2":    s * jax.random.normal(ks[7], (H,), jnp.float32),
        "W3":    s * jax.random.normal(ks[8], (1, H), jnp.float32),  # Linear(H,1).weight
        "b3":    s * jax.random.normal(ks[9], (1,), jnp.float32),
    }


def reference_forward_single(x, p):
    """Pure-JAX mirror of the PyTorch forward for one sample x = [value, date]."""
    emb_out = p["W_emb"][:, 0] * x[1] + p["b_emb"]                    # Linear(1,2) -> (2,)
    emb_scalar = jnp.dot(p["W_el"][0], emb_out) + p["b_el"][0]        # Linear(2,1) -> ()
    xin = jnp.stack([x[0], emb_scalar])                               # cat -> (2,)
    h = jnp.maximum(jnp.dot(p["W1"], xin) + p["b1"], 0.0)
    h = jnp.maximum(jnp.dot(p["W2"], h) + p["b2"], 0.0)
    y = jnp.dot(p["W3"], h) + p["b3"]                                 # (1,)
    return jax.nn.sigmoid(y)


if __name__ == "__main__":
    key = jax.random.PRNGKey(0)
    k_params, k_x = jax.random.split(key)
    params = init_params(k_params)

    # Preferred feature-major batch (2, B): rows = [value, date].  B is a non-multiple
    # of the lane width to exercise the ragged final tile and a 2-step "parallel" grid.
    B = 200
    xb = jax.random.normal(k_x, (2, B), jnp.float32)

    out = jax.block_until_ready(follower_reaction_forward(xb, params))
    ref = jax.vmap(lambda xi: reference_forward_single(xi, params), in_axes=1)(xb)[:, 0]
    assert out.shape == (B,), out.shape
    assert jnp.allclose(out, ref, atol=1e-5, rtol=1e-5), float(jnp.max(jnp.abs(out - ref)))

    # Sample-major (B, 2) convenience path gives the same result.
    out_t = jax.block_until_ready(follower_reaction_forward(xb.T, params))
    assert out_t.shape == (B,), out_t.shape
    assert jnp.allclose(out_t, ref, atol=1e-5, rtol=1e-5)

    # Original single-sample module semantics: x of shape (2,) -> output of shape (1,).
    x1 = xb[:, 0]
    out1 = jax.block_until_ready(follower_reaction_forward(x1, params))
    ref1 = reference_forward_single(x1, params)
    assert out1.shape == (1,), out1.shape
    assert jnp.allclose(out1, ref1, atol=1e-5, rtol=1e-5), (out1, ref1)

    print("KERNEL_OK")
</pallas_src>

<mosaic_0001>
module attributes {stable_mosaic.version = 11 : i64} {
  func.func @follower_kernel(%arg0: i32, %arg1: memref<2x128xf32, #tpu.memory_space<vmem>>, %arg2: memref<32x32xf32, #tpu.memory_space<vmem>>, %arg3: memref<32x8xf32, #tpu.memory_space<vmem>>, %arg4: memref<1x128xf32, #tpu.memory_space<vmem>>) attributes {dimension_semantics = [#tpu.dimension_semantics<parallel>], iteration_bounds = array<i64: 2>, scalar_prefetch = 0 : i64, scratch_operands = 0 : i64, tpu.core_type = #tpu.core_type<tc>, window_params = [{transform_indices = @transform_0, window_bounds = array<i64: 2, 128>}, {pipeline_mode = #tpu.pipeline_mode<synchronous>, transform_indices = @transform_1, window_bounds = array<i64: 32, 32>}, {pipeline_mode = #tpu.pipeline_mode<synchronous>, transform_indices = @transform_2, window_bounds = array<i64: 32, 8>}, {transform_indices = @transform_3, window_bounds = array<i64: 1, 128>}]} {
    %c0 = arith.constant 0 : index
    %c0_0 = arith.constant 0 : index
    %0 = vector.load %arg1[%c0, %c0_0] : memref<2x128xf32, #tpu.memory_space<vmem>>, vector<2x128xf32>
    %1 = vector.extract_strided_slice %0 {offsets = [0, 0], sizes = [1, 128], strides = [1, 1]} : vector<2x128xf32> to vector<1x128xf32>
    %2 = vector.extract_strided_slice %0 {offsets = [1, 0], sizes = [1, 128], strides = [1, 1]} : vector<2x128xf32> to vector<1x128xf32>
    %c0_1 = arith.constant 0 : index
    %c0_2 = arith.constant 0 : index
    %3 = vector.load %arg3[%c0_1, %c0_2] : memref<32x8xf32, #tpu.memory_space<vmem>>, vector<32x8xf32>
    %4 = vector.extract_strided_slice %3 {offsets = [0, 0], sizes = [32, 1], strides = [1, 1]} : vector<32x8xf32> to vector<32x1xf32>
    %5 = vector.extract_strided_slice %3 {offsets = [0, 1], sizes = [32, 1], strides = [1, 1]} : vector<32x8xf32> to vector<32x1xf32>
    %6 = vector.extract_strided_slice %3 {offsets = [0, 2], sizes = [32, 1], strides = [1, 1]} : vector<32x8xf32> to vector<32x1xf32>
    %7 = vector.extract_strided_slice %3 {offsets = [0, 3], sizes = [32, 1], strides = [1, 1]} : vector<32x8xf32> to vector<32x1xf32>
    %8 = vector.extract_strided_slice %3 {offsets = [0, 4], sizes = [32, 1], strides = [1, 1]} : vector<32x8xf32> to vector<32x1xf32>
    %9 = vector.extract_strided_slice %3 {offsets = [0, 5], sizes = [1, 1], strides = [1, 1]} : vector<32x8xf32> to vector<1x1xf32>
    %10 = vector.broadcast %4 : vector<32x1xf32> to vector<32x128xf32>
    %11 = vector.broadcast %1 : vector<1x128xf32> to vector<32x128xf32>
    %12 = arith.mulf %10, %11 : vector<32x128xf32>
    %13 = vector.broadcast %5 : vector<32x1xf32> to vector<32x128xf32>
    %14 = vector.broadcast %2 : vector<1x128xf32> to vector<32x128xf32>
    %15 = arith.mulf %13, %14 : vector<32x128xf32>
    %16 = arith.addf %12, %15 : vector<32x128xf32>
    %17 = vector.broadcast %6 : vector<32x1xf32> to vector<32x128xf32>
    %18 = arith.addf %16, %17 : vector<32x128xf32>
    %cst = arith.constant 0.000000e+00 : f32
    %19 = vector.broadcast %cst : f32 to vector<32x128xf32>
    %20 = arith.maximumf %18, %19 : vector<32x128xf32>
    %c0_3 = arith.constant 0 : index
    %c0_4 = arith.constant 0 : index
    %21 = vector.load %arg2[%c0_3, %c0_4] : memref<32x32xf32, #tpu.memory_space<vmem>>, vector<32x32xf32>
    %cst_5 = arith.constant dense<0.000000e+00> : vector<32x128xf32>
    %22 = tpu.matmul %21, %20, %cst_5 {dimension_numbers = #tpu.dot_dimension_numbers<[1], [0], [0], [1], [0, 0, 1, 1], [], []>} : vector<32x32xf32>, vector<32x128xf32>, vector<32x128xf32> -> vector<32x128xf32>
    %23 = vector.broadcast %7 : vector<32x1xf32> to vector<32x128xf32>
    %24 = arith.addf %22, %23 : vector<32x128xf32>
    %cst_6 = arith.constant 0.000000e+00 : f32
    %25 = vector.broadcast %cst_6 : f32 to vector<32x128xf32>
    %26 = arith.maximumf %24, %25 : vector<32x128xf32>
    %27 = vector.broadcast %8 : vector<32x1xf32> to vector<32x128xf32>
    %28 = arith.mulf %26, %27 : vector<32x128xf32>
    %cst_7 = arith.constant dense<0.000000e+00> : vector<128xf32>
    %29 = vector.multi_reduction <add>, %28, %cst_7 [0] : vector<32x128xf32> to vector<128xf32>
    %30 = vector.shape_cast %29 : vector<128xf32> to vector<1x128xf32>
    %31 = vector.broadcast %9 : vector<1x1xf32> to vector<1x128xf32>
    %32 = arith.addf %30, %31 : vector<1x128xf32>
    %33 = arith.negf %32 : vector<1x128xf32>
    %34 = math.exp %33 : vector<1x128xf32>
    %cst_8 = arith.constant 1.000000e+00 : f32
    %35 = vector.broadcast %cst_8 : f32 to vector<1x128xf32>
    %36 = arith.addf %35, %34 : vector<1x128xf32>
    %37 = arith.divf %35, %36 : vector<1x128xf32>
    %c0_9 = arith.constant 0 : index
    %c0_10 = arith.constant 0 : index
    %38 = vector.load %arg4[%c0_9, %c0_10] : memref<1x128xf32, #tpu.memory_space<vmem>>, vector<1x128xf32>
    tpu.vector_store %arg4[%c0_9, %c0_10], %37 {strides = array<i32>} : memref<1x128xf32, #tpu.memory_space<vmem>>, vector<1x128xf32>,
    return
  }
  func.func @transform_0(%arg0: i32) -> (i32, i32) {
    %c0_i32 = arith.constant 0 : i32
    %c0_i32_0 = arith.constant 0 : i32
    return %c0_i32, %arg0 : i32, i32
  }
  func.func @transform_1(%arg0: i32) -> (i32, i32) {
    %c0_i32 = arith.constant 0 : i32
    %c0_i32_0 = arith.constant 0 : i32
    %c0_i32_1 = arith.constant 0 : i32
    return %c0_i32, %c0_i32_0 : i32, i32
  }
  func.func @transform_2(%arg0: i32) -> (i32, i32) {
    %c0_i32 = arith.constant 0 : i32
    %c0_i32_0 = arith.constant 0 : i32
    %c0_i32_1 = arith.constant 0 : i32
    return %c0_i32, %c0_i32_0 : i32, i32
  }
  func.func @transform_3(%arg0: i32) -> (i32, i32) {
    %c0_i32 = arith.constant 0 : i32
    %c0_i32_0 = arith.constant 0 : i32
    return %c0_i32, %arg0 : i32, i32
  }
}

</mosaic_0001>

<bundles_post_ra>
// kernel: tpu_custom_call.1
= control target key start
LH: loop header
LB: loop body
LE: loop exit
PB: predicated region body
PF: predicated region fallthrough
CT: control target
= control target key end

     0   :  { %8 = vsyncpa [#allocation3], 0  ;;  %s798_s0 = inlined_call_operand.vmem [shape: f32[2,200], index: 0, kind: input, shape index: {}]   ;;  %s799_s1 = inlined_call_operand.vmem [shape: f32[32,32], index: 1, kind: input, shape index: {}]   ;;  %s800_s2 = inlined_call_operand.vmem [shape: f32[32,8], index: 2, kind: input, shape index: {}]   ;;  %s801_s3 = inlined_call_operand.hbm [shape: f32[1,200], index: 3, kind: output, shape index: {}]  }
   0x1   :  { %10 = vsyncpa [#allocation3 + $0x1], 0  ;;  %s677_s12 = smov 0   ;;  %s679_s13 = smov 0  }
   0x2   :  { %s681_s14 = smov 0   ;;  %s683_s15 = smov 0  }
   0x3 LB: > { %s698_s16 = sadd.s32 4294967295, %s648_s15   ;;  %s481_s17 = sadd.s32 4294967294, %s648_s15   ;;  %s648_s15 = sphi %s683_s15, %s807_s15   ;;  %s644_s14 = sphi %s681_s14, %s806_s14   ;;  %s640_s13 = sphi %s679_s13, %s805_s13   ;;  %s636_s12 = sphi %s677_s12, %s804_s12  }
   0x4   : > { %s702_s18 = sadd.s32 1, %s648_s15   ;;  %s91_s19 = sadd.s32 1, %s644_s14 }
   0x5   : > { %s88_s20 = ssub.s32 %s648_s15, %s702_s18  ;;  %p101_p0 = scmp.ne.s32.totalorder %s644_s14, %s640_s13 }
   0x6   : > { %p89_p1 = scmp.eq.s32.totalorder %s88_s20, 0  ;;  %p102_p2 = scmp.eq.s32.totalorder %s698_s16, 1 }
   0x7   : > { %p107_p3 = scmp.ne.s32.totalorder %s640_s13, %s636_s12  ;;  %p108_p4 = scmp.eq.s32.totalorder %s481_s17, 1 }
   0x8   : > { %s713_s21 = scalar_select %p89_p1, %s644_s14, %s91_s19  }
   0x9   : > { %p715_p5 = por %p102_p2, %p101_p0  ;;  %p719_p6 = por %p108_p4, %p107_p3 }
   0xa   : > { %p484_p7 = scmp.ge.s32.totalorder %s648_s15, 1  ;;  %p139_p8 = scmp.lt.s32.totalorder %s648_s15, 3 }
   0xc   : > { %p140_p9 = pnand %p484_p7, %p139_p8 }
   0xd   : > { %p161_p10 = scmp.lt.s32.totalorder (!%p140_p9), %s698_s16, 1  ;;  %s159_s27 = sand.u32 (!%p140_p9), 1, %s640_s13  }
   0xe   : > { %143 = sbr.rel (%p140_p9) target bundleno = 446 (0x1be), region = 32  ;;  %s491_s28 = sshll.u32 (!%p140_p9), %s698_s16, 4 }
   0xf   : > { %s160_s29 = scalar_lea.vmem (!%p140_p9), [#allocation2], %s159_s27  ;;  %s763_s6 = scalar_lea.hbm (!%p140_p9), %s801_s3, %s491_s28 }
  0x10   : > { %s426_s30 = sshll.u32 (!%p140_p9), %s160_s29, 4  ;;  %s414_s7 = scalar_lea.sflag (!%p140_p9), [#allocation3], %s159_s27  ;;  %s427_s30 = int_to_ptr.vmem [resolvable:$true] %s426_s30 }
  0x11   : > { %s588_s8 = scalar_lea.vmem (!%p140_p9), %s427_s30, 16 }
  0x12   : > { %p589_p11 = scmp.ne.s32.totalorder (!%p140_p9), %s427_s30, %s588_s8 }
  0x13   : > { %v169_v0 = vld [vmem:[%s800_s2 + $0x18] sm:$0xff]  ;;  %v168_v1 = vld [vmem:[%s800_s2 + $0x10] sm:$0xff]  ;;  %v650_v2 = vmov 1   ;;  %v651_v3 = vmov 0   ;;  %v167_v4 = vld [vmem:[%s800_s2 + $0x8] sm:$0xff]  ;;  %v652_v6 = vmov 2   ;;  %v190_v12 = vlaneseq }
  0x14   : > { %569 = vset.pattern.permute.xlu0 %v650_v2  ;;  %570 = vset.pattern.permute.xlu1 %v651_v3  ;;  %v166_v5 = vld [vmem:[%s800_s2] sm:$0xff]  ;;  %vm270_vm0 = vcmask 261120   ;;  %v252_v8 = vld [vmem:[%s799_s1 + $0x10] sm:$0xff]  ;;  %v653_v9 = vmov 3   ;;  %v654_v10 = vmov 4   ;;  %v655_v11 = vmov 5   ;;  %p590_p12 = pnand %p589_p11, %p715_p5 }
  0x15   : > { %211 = vperm.xlu0 %569, %v169_v0   ;;  %182 = vperm.xlu1 %570, %v168_v1   ;;  %v250_v7 = vld [vmem:[%s799_s1] sm:$0xff]  ;;  %s162_s9 = scalar_select %p161_p10, %s698_s16, 1  ;;  %v191_v13 = vshrl.u32 %v190_v12, 7  ;;  %v251_v51 = vld [vmem:[%s799_s1 + $0x8] sm:$0xff]  ;;  %v253_v52 = vld [vmem:[%s799_s1 + $0x18] sm:$0xff] }
  0x16   : > { %510 = vmatprep.mubr.msk.f32.mxu0 %vm270_vm0, %v250_v7  ;;  %513 = vmatprep.mubr.msk.f32.mxu1 %vm270_vm0, %v252_v8  ;;  %p591_p13 = pneg %p590_p12 }
  0x17   : > { %s485_s10 = sshll.u32 %s162_s9, 1  ;;  %v192_v16 = vsub.s32 0, %v191_v13  ;;  %v216_v17 = vsub.s32 1, %v191_v13  ;;  %s656_s9 = smov [#allocation2]  }
  0x18   : > { %s164_s19 = scalar_lea.vmem %s798_s0, %s485_s10  ;;  %s592_s10 = sshll.u32 %s656_s9, 4  ;;  %s593_s10 = int_to_ptr.vmem [resolvable:$false] %s592_s10 }
  0x19   : > { %571 = vset.pattern.permute.xlu1 %v650_v2  ;;  %203 = vperm.xlu0 %569, %v167_v4   ;;  %v165_v19 = vld [vmem:[%s164_s19] sm:$0x3]  ;;  %s594_s16 = scalar_lea.vmem %s593_s10, 32  ;;  %p595_p0 = scmp.lt.s32.totalorder %s427_s30, %s593_s10 }
  0x1a   : > { %207 = vperm.xlu1 %571, %v168_v1   ;;  %v193_v21 = vrot.slane %v165_v19, %v192_v16  ;;  %v217_v22 = vrot.slane %v165_v19, %v216_v17  ;;  %p596_p1 = scmp.lt.s32.totalorder %s594_s16, %s588_s8 }
  0x1c   : > { %p597_p2 = por %p596_p1, %p595_p0 }
  0x1d   : > { %573 = vset.pattern.permute.xlu0 %v651_v3 }
  0x1e   : > { %572 = vset.pattern.permute.xlu1 %v651_v3  ;;  %187 = vperm.xlu0 %573, %v169_v0   ;;  %p598_p3 = pnand %p597_p2, %p591_p13 }
  0x1f   : > { %177 = vperm.xlu1 %572, %v167_v4  }
  0x22   : > { %172 = vperm.xlu0 %573, %v166_v5  }
  0x23   : > { %574 = vset.pattern.permute.xlu1 %v652_v6 }
  0x24   : > { %239 = vperm.xlu1 %574, %v169_v0  }
  0x26   : > { %577 = vset.pattern.permute.xlu0 %v652_v6 }
  0x27   : > { %231 = vperm.xlu0 %577, %v167_v4  }
  0x28   : > { %575 = vset.pattern.permute.xlu1 %v650_v2 }
  0x29   : > { %199 = vperm.xlu1 %575, %v166_v5  }
  0x2b   : > { %579 = vset.pattern.permute.xlu0 %v653_v9 }
  0x2c   : > { %259 = vperm.xlu0 %579, %v167_v4  }
  0x2d   : > { %576 = vset.pattern.permute.xlu1 %v652_v6 }
  0x2e   : > { %235 = vperm.xlu1 %576, %v168_v1  }
  0x30   : > { %580 = vset.pattern.permute.xlu0 %v654_v10 }
  0x31   : > { %373 = vperm.xlu0 %580, %v166_v5  }
  0x32   : > { %227 = vperm.xlu1 %576, %v166_v5  }
  0x35   : > { %385 = vperm.xlu0 %580, %v169_v0  }
  0x36   : > { %578 = vset.pattern.permute.xlu1 %v653_v9 }
  0x37   : > { %255 = vperm.xlu1 %578, %v166_v5  }
  0x39   : > { %583 = vset.pattern.permute.xlu0 %v655_v11 }
  0x3b   : > { %263 = vperm.xlu1 %578, %v168_v1  }
  0x3f   : > { %267 = vperm.xlu1 %578, %v169_v0  }
  0x43   : > { %581 = vset.pattern.permute.xlu1 %v654_v10 }
  0x44   : > { %377 = vperm.xlu1 %581, %v167_v4  }
  0x48   : > { %381 = vperm.xlu1 %581, %v168_v1  }
  0x4c   : > { %582 = vset.pattern.permute.xlu1 %v655_v11 }
  0x4d   : > { %402 = vperm.xlu1 %582, %v166_v5  }
  0x90   : > { %v183_v14 = vpop.permute.xlu1 %182  ;;  %v212_v15 = vpop.permute.xlu0 %211 }
  0x91   : > { %v221_v24 = vmul.f32 %v217_v22, %v212_v15  ;;  %v196_v36 = vmul.f32 %v193_v21, %v183_v14 }
  0x94   : > { %v204_v18 = vpop.permute.xlu0 %203 }
  0x95   : > { %v208_v20 = vpop.permute.xlu1 %207  ;;  %v219_v33 = vmul.f32 %v217_v22, %v204_v18 }
  0x96   : > { %v220_v32 = vmul.f32 %v217_v22, %v208_v20 }
  0x98   : > { %v224_v40 = vadd.f32 %v220_v32, %v196_v36 }
  0x99   : > { %v188_v23 = vpop.permute.xlu0 %187 }
  0x9a   : > { %v197_v25 = vmul.f32 %v193_v21, %v188_v23  ;;  %v178_v26 = vpop.permute.xlu1 %177 }
  0x9b   : > { %v195_v34 = vmul.f32 %v193_v21, %v178_v26 }
  0x9c   : > { %v225_v27 = vadd.f32 %v221_v24, %v197_v25 }
  0x9d   : > { %v173_v30 = vpop.permute.xlu0 %172  ;;  %v223_v38 = vadd.f32 %v219_v33, %v195_v34 }
  0x9e   : > { %v194_v42 = vmul.f32 %v193_v21, %v173_v30 }
  0x9f   : > { %v240_v28 = vpop.permute.xlu1 %239 }
  0xa0   : > { %v245_v29 = vadd.f32 %v240_v28, %v225_v27 }
  0xa2   : > { %v249_v31 = vmax.f32 %v245_v29, 0.0  ;;  %v232_v37 = vpop.permute.xlu0 %231 }
  0xa3   : > { %v243_v43 = vadd.f32 %v232_v37, %v223_v38 }
  0xa4   : > { %v200_v35 = vpop.permute.xlu1 %199  ;;  %502 = vmatprep.subr.mxu0 %v249_v31  ;;  %516 = vmatprep.subr.mxu1 %v249_v31 }
  0xa5   : > { %503 = vmatpush3.msra.mxu0 %v249_v31  ;;  %520 = vmatpush3.msra.mxu1 %v249_v31  ;;  %v218_v39 = vmul.f32 %v217_v22, %v200_v35  ;;  %v247_v48 = vmax.f32 %v243_v43, 0.0 }
  0xa7   : > { %v222_v46 = vadd.f32 %v218_v39, %v194_v42  ;;  %v260_v55 = vpop.permute.xlu0 %259 }
  0xa9   : > { %v236_v41 = vpop.permute.xlu1 %235 }
  0xaa   : > { %v244_v44 = vadd.f32 %v236_v41, %v224_v40 }
  0xac   : > { %v248_v45 = vmax.f32 %v244_v44, 0.0  ;;  %v374_v60 = vpop.permute.xlu0 %373 }
  0xad   : > { %v228_v47 = vpop.permute.xlu1 %227 }
  0xae   : > { %v242_v49 = vadd.f32 %v228_v47, %v222_v46  ;;  %504 = vmatprep.subr.mxu0 %v248_v45  ;;  %517 = vmatprep.subr.mxu1 %v248_v45 }
  0xaf   : > { %505 = vmatpush3.msra.mxu0 %v248_v45  ;;  %521 = vmatpush3.msra.mxu1 %v248_v45 }
  0xb0   : > { %v246_v50 = vmax.f32 %v242_v49, 0.0  ;;  %506 = vmatprep.subr.mxu0 %v247_v48  ;;  %518 = vmatprep.subr.mxu1 %v247_v48  ;;  %v386_v10 = vpop.permute.xlu0 %385 }
  0xb1   : > { %507 = vmatpush3.msra.mxu0 %v247_v48  ;;  %522 = vmatpush3.msra.mxu1 %v247_v48 }
  0xb2   : > { %508 = vmatprep.subr.mxu0 %v246_v50  ;;  %519 = vmatprep.subr.mxu1 %v246_v50  ;;  %v256_v53 = vpop.permute.xlu1 %255 }
  0xb3   : > { %509 = vmatpush3.msra.mxu0 %v246_v50  ;;  %523 = vmatpush3.msra.mxu1 %v246_v50 }
  0xb4   : > { %511 = vmatmul.mubr.msk.f32.vlgmr.msra.gmra.mxu0 %vm270_vm0, %v251_v51  ;;  %514 = vmatmul.mubr.msk.f32.vlgmr.msra.gmra.mxu1 %vm270_vm0, %v253_v52 }
  0xb6   : > { %v264_v54 = vpop.permute.xlu1 %263 }
  0xba   : > { %v268_v56 = vpop.permute.xlu1 %267 }
  0xbf   : > { %v378_v59 = vpop.permute.xlu1 %377 }
  0xc3   : > { %v382_v9 = vpop.permute.xlu1 %381 }
  0xc8   : > { %v403_v21 = vpop.permute.xlu1 %402 }
 0x174   : > { %v512_v57 = vpop.f32.mrf.mxu0  ;;  %v515_v58 = vpop.f32.mrf.mxu1 }
 0x175   : > { %v355_v61 = vadd.f32 %v512_v57, %v260_v55  ;;  %v365_v1 = vadd.f32 %v515_v58, %v268_v56 }
 0x176   : > { %v349_v62 = vpop.f32.mrf.mxu0  ;;  %v359_v63 = vpop.f32.mrf.mxu1 }
 0x177   : > { %v369_v0 = vmax.f32 %v355_v61, 0.0  ;;  %v350_v2 = vadd.f32 %v349_v62, %v256_v53  ;;  %v360_v3 = vadd.f32 %v359_v63, %v264_v54  ;;  %v371_v7 = vmax.f32 %v365_v1, 0.0 }
 0x179   : > { %v368_v4 = vmax.f32 %v350_v2, 0.0  ;;  %v370_v5 = vmax.f32 %v360_v3, 0.0  ;;  %v389_v6 = vmul.f32 %v378_v59, %v369_v0  ;;  %v391_v14 = vmul.f32 %v386_v10, %v371_v7 }
 0x17b   : > { %v388_v8 = vmul.f32 %v374_v60, %v368_v4  ;;  %v390_v11 = vmul.f32 %v382_v9, %v370_v5 }
 0x17d   : > { %v392_v12 = vadd.f32 %v389_v6, %v388_v8 }
 0x17f   : > { %v393_v13 = vadd.f32 %v392_v12, %v390_v11 }
 0x181   : > { %v394_v15 = vadd.f32 %v393_v13, %v391_v14 }
 0x183   : > { %v395_v16 = vrot.slane %v394_v15, 4 }
 0x185   : > { %v396_v17 = vadd.f32 %v395_v16, %v394_v15 }
 0x187   : > { %v397_v18 = vrot.slane %v396_v17, 2 }
 0x189   : > { %v398_v19 = vadd.f32 %v397_v18, %v396_v17 }
 0x18b   : > { %v399_v20 = vrot.slane %v398_v19, 1 }
 0x18d   : > { %v400_v22 = vadd.f32 %v399_v20, %v398_v19 }
 0x18f   : > { %v405_v23 = vadd.f32 %v403_v21, %v400_v22 }
 0x191   : > { %v490_v24 = vmul.f32 -1.442695, %v405_v23 }
 0x193   : > { %584 = vpow2.f32 %v490_v24 }
 0x1a0   : > { %v585_v25 = vpop.eup %584 }
 0x1a1   : > { %v409_v26 = vadd.f32 1.0, %v585_v25 }
 0x1a3   : > { %586 = vrcp.f32 %v409_v26 }
 0x1b0   : > { %v587_v27 = vpop.eup %586 }
 0x1b1   : > { %412 = vst [vmem:[%s160_s29] sm:$0x1] %v587_v27 }
 0x1b2   : > { %601 = shalt.err (!%p598_p3)
}
 0x1b3   : > { %s602_s11 = scalar_lea.hbm %s763_s6, 16  ;;  %s606_s20 = scalar_lea.hbm %s801_s3, 32 }
 0x1b4   : > { %p603_p4 = scmp.ne.s32.totalorder %s763_s6, %s602_s11  ;;  %p607_p9 = scmp.lt.s32.totalorder %s763_s6, %s801_s3 }
 0x1b5   : > { %p608_p10 = scmp.lt.s32.totalorder %s606_s20, %s602_s11 }
 0x1b6   : > { %p604_p7 = pnand %p603_p4, %p715_p5 }
 0x1b7   : > { %p609_p11 = por %p608_p10, %p607_p9 }
 0x1b8   : > { %p605_p8 = pneg %p604_p7 }
 0x1ba   : > { %p610_p12 = pnand %p609_p11, %p605_p8 }
 0x1bc   : > { %613 = shalt.err (!%p610_p12)
}
 0x1bd   : > { %524 = dma.vmem_to_hbm [thread:$0]  (%p715_p5), %s427_s30, 16, %s763_s6, %s414_s7  }
 0x1be PF: > { %p530_p13 = scmp.ge.s32.totalorder %s648_s15, 2  ;;  %s438_s26 = sand.u32 1, %s636_s12  }
 0x1bf   : > { %s439_s27 = scalar_lea.sflag [#allocation3], %s438_s26 }
 0x1c0   : > { %p527_p0 = pnand %p530_p13, %p719_p6 }
 0x1c2   : > { %p528_p1 = pneg %p527_p0 }
 0x1c4   : > { %631 = dma.done.wait (%p528_p1), %s439_s27, 16  }
 0x1c5   : > { %633 = vsyncadd (%p528_p1), %s439_s27, 4294967280  ;;  %p13_p2 = scmp.ge.s32.totalorder %s702_s18, 4   ;;  %s804_s12 = smov %s640_s13 }
 0x1c6   : > { %s805_s13 = smov %s644_s14  ;;  %s806_s14 = smov %s713_s21 }
 0x1c7   : > { %s807_s15 = smov %s702_s18  ;;  %15 = sbr.rel (!%p13_p2) target bundleno = 3 (0x3), region = 67 }
 0x1cc   :  { %443 = vsyncpa [#allocation3], 1 }
 0x1cd   :  { %445 = vsyncpa [#allocation3 + $0x1], 1 }

</bundles_post_ra>
